<compile_context>
chip_gen: v7x
topology: tpu7x:2x2x1
jax: 0.10.0
libtpu: 0.0.40
codegen_flags: <defaults>
</compile_context>

<pallas_src>
import numpy as np
import jax
import jax.numpy as jnp
from jax import lax
from jax.experimental import pallas as pl
from jax.experimental.pallas import tpu as pltpu


def _round_up(x: int, m: int) -> int:
    return (x + m - 1) // m * m


def tgaa_mlp_kernel(x_ref, cid_ref, w1_ref, bias_ref, w2_ref, out_ref, acc_ref):
    """One grid step of the fused TGAA_MLP forward.

    x_ref   : [TN, D]             packed cell features for this tile (bf16)
    cid_ref : [1, TN]             int32 combined id = dim * B_pad + graph (-1 = pad)
    w1_ref  : [D, n_dims*H]       f32 lin1 weights stacked along the output axis
    bias_ref: [1, LB]             f32 packed biases: b1 (n_dims*H) | pad | b2 (OUT_PAD)
    w2_ref  : [n_dims*H, OUT_PAD] f32 lin2 weights, lane padded
    out_ref : [B_pad, OUT_PAD]
    acc_ref : [n_dims*B_pad, D]   f32 segment-sum accumulator (VMEM scratch)
    """
    k = pl.program_id(0)
    nb, _ = acc_ref.shape
    b_pad, out_pad = out_ref.shape
    n_dims = nb // b_pad
    hdim = w1_ref.shape[1] // n_dims
    tn = x_ref.shape[0]

    @pl.when(k == 0)
    def _init():
        acc_ref[...] = jnp.zeros_like(acc_ref)

    # (dim, graph) one-hot: rows = combined ids (sublanes), lanes = cells of this
    # tile.  Padding rows carry cid == -1 and never match.
    onehot = (lax.broadcasted_iota(jnp.int32, (nb, tn), 0)
              == cid_ref[...]).astype(x_ref.dtype)
    # MXU: per-(dim, graph) segment-sum of this tile; contraction over the big
    # cell axis, f32 accumulation (lin1/lin2 applied after the sum -> exact
    # match of the reference ordering).
    acc_ref[...] += jnp.dot(onehot, x_ref[...],
                            preferred_element_type=jnp.float32)

    @pl.when(k == pl.num_programs(0) - 1)
    def _finalize():
        # out = concat_i(relu(S_i @ W1_i + b1_i)) @ W2 + b2
        #     = sum_i relu(S_i @ W1_i + b1_i) @ W2[i*H:(i+1)*H, :] + b2
        b2 = bias_ref[:, bias_ref.shape[1] - out_pad:]
        out = jnp.zeros((b_pad, out_pad), jnp.float32) + b2
        for i in range(n_dims):                                 # static, tiny, runs once
            s_i = acc_ref[i * b_pad:(i + 1) * b_pad, :]          # [B_pad, D] f32
            w1_i = w1_ref[:, i * hdim:(i + 1) * hdim]            # [D, H]
            b1_i = bias_ref[:, i * hdim:(i + 1) * hdim]          # [1, H]
            h_i = jnp.maximum(
                jnp.dot(s_i, w1_i, preferred_element_type=jnp.float32) + b1_i, 0.0)
            out = out + jnp.dot(h_i, w2_ref[i * hdim:(i + 1) * hdim, :],
                                preferred_element_type=jnp.float32)
        out_ref[...] = out


def tgaa_mlp_pallas(x_packed, gid, did, lin1_params, lin2_params, batch_size,
                    n_dims, *, tile_n=1024, compute_dtype=jnp.bfloat16):
    """Fused forward on a pre-packed [N, D] cell buffer.

    Callers that already keep their cochains packed (x_packed, graph-id, dim-id)
    should call this directly and avoid re-materializing x in HBM.
    """
    n_total, dfeat = x_packed.shape
    hdim = lin1_params[0][0].shape[1]
    w2, b2 = lin2_params
    out_size = w2.shape[1]

    b_pad = _round_up(max(int(batch_size), 1), 8)        # sublane-dense batch
    nb = n_dims * b_pad
    out_pad = _round_up(max(out_size, 1), 128)           # lane-dense output

    # ---- tile the packed cell axis (multiple of 128 lanes for the id row) ----
    tile_n = _round_up(max(int(tile_n), 128), 128)
    tn = min(tile_n, _round_up(max(n_total, 1), 128))
    num_tiles = int(pl.cdiv(max(n_total, 1), tn))
    n_pad = num_tiles * tn

    # ---- big per-cell operands: bf16 features + one int32 id row ----
    x_cat = x_packed.astype(compute_dtype)
    cid = did.astype(jnp.int32) * b_pad + gid.astype(jnp.int32)
    pad = n_pad - n_total
    if pad:
        x_cat = jnp.pad(x_cat, ((0, pad), (0, 0)))
        cid = jnp.pad(cid, (0, pad), constant_values=-1)
    cid = cid.reshape(1, n_pad)

    # ---- small resident operands (f32, used once on the final step) ----
    w1_stack = jnp.concatenate(
        [w.astype(jnp.float32) for (w, _) in lin1_params], axis=1)       # [D, n_dims*H]
    b1_cat = jnp.concatenate(
        [jnp.reshape(b, (1, -1)).astype(jnp.float32) for (_, b) in lin1_params],
        axis=1)                                                           # [1, n_dims*H]
    b1_lanes = _round_up(n_dims * hdim, 128)
    bias_buf = jnp.zeros((1, b1_lanes + out_pad), jnp.float32)
    bias_buf = bias_buf.at[:, :n_dims * hdim].set(b1_cat)
    bias_buf = bias_buf.at[:, b1_lanes:b1_lanes + out_size].set(
        jnp.reshape(b2, (1, -1)).astype(jnp.float32))
    w2_pad = jnp.pad(w2.astype(jnp.float32), ((0, 0), (0, out_pad - out_size)))

    # ---- advisory cost + explicit VMEM budget (per-generation safe) ----
    x_bytes = np.dtype(compute_dtype).itemsize
    flops = (2 * n_pad * nb * dfeat                       # segment-sum dot over N
             + n_dims * 2 * b_pad * dfeat * hdim          # lin1 (once)
             + n_dims * 2 * b_pad * hdim * out_pad)       # lin2 (once)
    bytes_accessed = (n_pad * dfeat * x_bytes + n_pad * 4
                      + (w1_stack.size + bias_buf.size + w2_pad.size) * 4
                      + b_pad * out_pad * 4)
    cost = pl.CostEstimate(flops=flops, transcendentals=0,
                           bytes_accessed=bytes_accessed)

    lane = 128
    vmem_bytes = (2 * tn * max(dfeat, lane) * x_bytes      # double-buffered x tiles
                  + 2 * 8 * tn * 4                         # double-buffered id tiles
                  + (w1_stack.size + bias_buf.size + w2_pad.size) * 4
                  + nb * max(dfeat, lane) * 4              # accumulator
                  + 2 * b_pad * out_pad * 4)               # output
    vmem_limit = int(min(max(2 * vmem_bytes + (8 << 20), 16 << 20), 64 << 20))

    grid_spec = pltpu.PrefetchScalarGridSpec(
        num_scalar_prefetch=0,
        grid=(num_tiles,),
        in_specs=[
            pl.BlockSpec((tn, dfeat), lambda k: (k, 0)),       # x tile (pipelined)
            pl.BlockSpec((1, tn), lambda k: (0, k)),           # id tile (pipelined)
            pl.BlockSpec(w1_stack.shape, lambda k: (0, 0)),    # resident weights
            pl.BlockSpec(bias_buf.shape, lambda k: (0, 0)),
            pl.BlockSpec(w2_pad.shape, lambda k: (0, 0)),
        ],
        out_specs=pl.BlockSpec((b_pad, out_pad), lambda k: (0, 0)),
        scratch_shapes=[pltpu.VMEM((nb, dfeat), jnp.float32)],
    )

    out = pl.pallas_call(
        tgaa_mlp_kernel,
        grid_spec=grid_spec,
        out_shape=jax.ShapeDtypeStruct((b_pad, out_pad), jnp.float32),
        compiler_params=pltpu.CompilerParams(
            dimension_semantics=("arbitrary",),
            vmem_limit_bytes=vmem_limit),
        cost_estimate=cost,
    )(x_cat, cid, w1_stack, bias_buf, w2_pad)

    # slice off padded graphs (rows) AND padded output lanes (columns)
    return out[:batch_size, :out_size]


def tgaa_mlp_forward(xs, batch_idxs, lin1_params, lin2_params, batch_size, **kwargs):
    """List-of-cochains entry point: packs xs into one [N, D] buffer + id rows.

    Callers that already keep cells packed should use tgaa_mlp_pallas directly to
    avoid the extra HBM round-trip of this concat.
    """
    x_packed = jnp.concatenate(xs, axis=0)
    gid = jnp.concatenate([jnp.asarray(b).reshape(-1).astype(jnp.int32)
                           for b in batch_idxs])
    did = jnp.concatenate([jnp.full((x.shape[0],), i, jnp.int32)
                           for i, x in enumerate(xs)])
    return tgaa_mlp_pallas(x_packed, gid, did, lin1_params, lin2_params,
                           batch_size, len(xs), **kwargs)


def _linear_init(key, fan_in, fan_out):
    kw, kb = jax.random.split(key)
    bound = 1.0 / float(np.sqrt(fan_in))
    w = jax.random.uniform(kw, (fan_in, fan_out), jnp.float32, -bound, bound)
    b = jax.random.uniform(kb, (1, fan_out), jnp.float32, -bound, bound)
    return w, b


if __name__ == "__main__":
    # Small, module-consistent shapes (NoEmbed path: features are already embed_dim wide).
    embed_dim = 32
    final_hidden_multiplier = 2
    max_dim = 2
    out_size = 8
    batch_size = 4
    H = final_hidden_multiplier * embed_dim
    num_cells = [96, 160, 64]        # nodes, edges, 2-cells

    key = jax.random.PRNGKey(0)
    keys = jax.random.split(key, 8)

    xs = [jax.random.normal(keys[i], (num_cells[i], embed_dim), jnp.float32)
          for i in range(max_dim + 1)]
    # deterministic graph assignment: cells of each cochain split into quarters
    batch_idxs = [
        ((jnp.arange(n, dtype=jnp.int32) * batch_size) // n).astype(jnp.int32).reshape(n, 1)
        for n in num_cells
    ]
    lin1_params = [_linear_init(keys[3 + i], embed_dim, H) for i in range(max_dim + 1)]
    lin2_params = _linear_init(keys[6], H * (max_dim + 1), out_size)

    # tile_n=128 deliberately exercises the multi-tile (grid > 1) accumulator path.
    out = tgaa_mlp_forward(xs, batch_idxs, lin1_params, lin2_params, batch_size,
                           tile_n=128)
    out = jax.block_until_ready(out)

    # ---- float64 numpy reference (scatter-sum + lin1/relu + concat + lin2) ----
    hs = []
    for i in range(max_dim + 1):
        s = np.zeros((batch_size, embed_dim), np.float64)
        np.add.at(s, np.asarray(batch_idxs[i][:, 0]), np.asarray(xs[i], np.float64))
        w1, b1 = lin1_params[i]
        hs.append(np.maximum(s @ np.asarray(w1, np.float64)
                             + np.asarray(b1, np.float64), 0.0))
    w2, b2 = lin2_params
    ref = (np.concatenate(hs, axis=-1) @ np.asarray(w2, np.float64)
           + np.asarray(b2, np.float64))

    assert out.shape == (batch_size, out_size)
    err = float(np.max(np.abs(np.asarray(out, np.float64) - ref)))
    # bf16 feature inputs (f32 accumulation) -> tolerance vs the f64 reference.
    assert err < 5e-2, f"max abs err {err}"
    print("KERNEL_OK")
</pallas_src>

<mosaic_0001>
module attributes {stable_mosaic.version = 11 : i64} {
  func.func @tgaa_mlp_kernel(%arg0: i32, %arg1: memref<128x32xbf16, #tpu.memory_space<vmem>>, %arg2: memref<1x128xi32, #tpu.memory_space<vmem>>, %arg3: memref<32x192xf32, #tpu.memory_space<vmem>>, %arg4: memref<1x384xf32, #tpu.memory_space<vmem>>, %arg5: memref<192x128xf32, #tpu.memory_space<vmem>>, %arg6: memref<8x128xf32, #tpu.memory_space<vmem>>, %arg7: memref<24x32xf32, #tpu.memory_space<vmem>>) attributes {dimension_semantics = [#tpu.dimension_semantics<arbitrary>], iteration_bounds = array<i64: 3>, scalar_prefetch = 0 : i64, scratch_operands = 1 : i64, tpu.core_type = #tpu.core_type<tc>, window_params = [{transform_indices = @transform_0, window_bounds = array<i64: 128, 32>}, {transform_indices = @transform_1, window_bounds = array<i64: 1, 128>}, {pipeline_mode = #tpu.pipeline_mode<synchronous>, transform_indices = @transform_2, window_bounds = array<i64: 32, 192>}, {pipeline_mode = #tpu.pipeline_mode<synchronous>, transform_indices = @transform_3, window_bounds = array<i64: 1, 384>}, {pipeline_mode = #tpu.pipeline_mode<synchronous>, transform_indices = @transform_4, window_bounds = array<i64: 192, 128>}, {pipeline_mode = #tpu.pipeline_mode<synchronous>, transform_indices = @transform_5, window_bounds = array<i64: 8, 128>}]} {
    %c0_i32 = arith.constant 0 : i32
    %0 = arith.cmpi eq, %arg0, %c0_i32 : i32
    %1 = arith.extui %0 : i1 to i32
    %c0_i32_0 = arith.constant 0 : i32
    %2 = arith.cmpi ne, %1, %c0_i32_0 : i32
    scf.if %2 {
      %cst_9 = arith.constant 0.000000e+00 : f32
      %18 = vector.broadcast %cst_9 : f32 to vector<24x32xf32>
      %c0_10 = arith.constant 0 : index
      %c0_11 = arith.constant 0 : index
      %19 = vector.load %arg7[%c0_10, %c0_11] : memref<24x32xf32, #tpu.memory_space<vmem>>, vector<24x32xf32>
      tpu.vector_store %arg7[%c0_10, %c0_11], %18 {strides = array<i32>} : memref<24x32xf32, #tpu.memory_space<vmem>>, vector<24x32xf32>,
    } else {
    }
    %3 = tpu.iota {dimensions = array<i32: 0>} : vector<24x128xi32>
    %c0 = arith.constant 0 : index
    %c0_1 = arith.constant 0 : index
    %4 = vector.load %arg2[%c0, %c0_1] : memref<1x128xi32, #tpu.memory_space<vmem>>, vector<1x128xi32>
    %5 = vector.broadcast %4 : vector<1x128xi32> to vector<24x128xi32>
    %6 = arith.cmpi eq, %3, %5 : vector<24x128xi32>
    %7 = arith.extui %6 : vector<24x128xi1> to vector<24x128xi32>
    %8 = arith.sitofp %7 : vector<24x128xi32> to vector<24x128xf32>
    %9 = arith.truncf %8 : vector<24x128xf32> to vector<24x128xbf16>
    %c0_2 = arith.constant 0 : index
    %c0_3 = arith.constant 0 : index
    %10 = vector.load %arg7[%c0_2, %c0_3] : memref<24x32xf32, #tpu.memory_space<vmem>>, vector<24x32xf32>
    %c0_4 = arith.constant 0 : index
    %c0_5 = arith.constant 0 : index
    %11 = vector.load %arg1[%c0_4, %c0_5] : memref<128x32xbf16, #tpu.memory_space<vmem>>, vector<128x32xbf16>
    %cst = arith.constant dense<0.000000e+00> : vector<24x32xf32>
    %12 = tpu.matmul %9, %11, %cst {dimension_numbers = #tpu.dot_dimension_numbers<[1], [0], [0], [1], [0, 0, 1, 1], [], []>} : vector<24x128xbf16>, vector<128x32xbf16>, vector<24x32xf32> -> vector<24x32xf32>
    %13 = arith.addf %10, %12 : vector<24x32xf32>
    %c0_6 = arith.constant 0 : index
    %c0_7 = arith.constant 0 : index
    %14 = vector.load %arg7[%c0_6, %c0_7] : memref<24x32xf32, #tpu.memory_space<vmem>>, vector<24x32xf32>
    tpu.vector_store %arg7[%c0_6, %c0_7], %13 {strides = array<i32>} : memref<24x32xf32, #tpu.memory_space<vmem>>, vector<24x32xf32>,
    %c2_i32 = arith.constant 2 : i32
    %15 = arith.cmpi eq, %arg0, %c2_i32 : i32
    %16 = arith.extui %15 : i1 to i32
    %c0_i32_8 = arith.constant 0 : i32
    %17 = arith.cmpi ne, %16, %c0_i32_8 : i32
    scf.if %17 {
      %c0_9 = arith.constant 0 : index
      %c256 = arith.constant 256 : index
      %18 = vector.load %arg4[%c0_9, %c256] : memref<1x384xf32, #tpu.memory_space<vmem>>, vector<1x128xf32>
      %cst_10 = arith.constant 0.000000e+00 : f32
      %19 = vector.broadcast %cst_10 : f32 to vector<8x128xf32>
      %20 = vector.broadcast %18 : vector<1x128xf32> to vector<8x128xf32>
      %21 = arith.addf %19, %20 : vector<8x128xf32>
      %c0_11 = arith.constant 0 : index
      %c0_12 = arith.constant 0 : index
      %22 = vector.load %arg7[%c0_11, %c0_12] : memref<24x32xf32, #tpu.memory_space<vmem>>, vector<8x32xf32>
      %c0_13 = arith.constant 0 : index
      %c0_14 = arith.constant 0 : index
      %23 = vector.load %arg3[%c0_13, %c0_14] : memref<32x192xf32, #tpu.memory_space<vmem>>, vector<32x64xf32>
      %c0_15 = arith.constant 0 : index
      %c0_16 = arith.constant 0 : index
      %24 = vector.load %arg4[%c0_15, %c0_16] : memref<1x384xf32, #tpu.memory_space<vmem>>, vector<1x64xf32>
      %cst_17 = arith.constant dense<0.000000e+00> : vector<8x64xf32>
      %25 = tpu.matmul %22, %23, %cst_17 {dimension_numbers = #tpu.dot_dimension_numbers<[1], [0], [0], [1], [0, 0, 1, 1], [], []>} : vector<8x32xf32>, vector<32x64xf32>, vector<8x64xf32> -> vector<8x64xf32>
      %26 = vector.broadcast %24 : vector<1x64xf32> to vector<8x64xf32>
      %27 = arith.addf %25, %26 : vector<8x64xf32>
      %cst_18 = arith.constant 0.000000e+00 : f32
      %28 = vector.broadcast %cst_18 : f32 to vector<8x64xf32>
      %29 = arith.maximumf %27, %28 : vector<8x64xf32>
      %c0_19 = arith.constant 0 : index
      %c0_20 = arith.constant 0 : index
      %30 = vector.load %arg5[%c0_19, %c0_20] : memref<192x128xf32, #tpu.memory_space<vmem>>, vector<64x128xf32>
      %cst_21 = arith.constant dense<0.000000e+00> : vector<8x128xf32>
      %31 = tpu.matmul %29, %30, %cst_21 {dimension_numbers = #tpu.dot_dimension_numbers<[1], [0], [0], [1], [0, 0, 1, 1], [], []>} : vector<8x64xf32>, vector<64x128xf32>, vector<8x128xf32> -> vector<8x128xf32>
      %32 = arith.addf %21, %31 : vector<8x128xf32>
      %c8 = arith.constant 8 : index
      %c0_22 = arith.constant 0 : index
      %33 = vector.load %arg7[%c8, %c0_22] : memref<24x32xf32, #tpu.memory_space<vmem>>, vector<8x32xf32>
      %c0_23 = arith.constant 0 : index
      %c64 = arith.constant 64 : index
      %34 = vector.load %arg3[%c0_23, %c64] : memref<32x192xf32, #tpu.memory_space<vmem>>, vector<32x64xf32>
      %c0_24 = arith.constant 0 : index
      %c64_25 = arith.constant 64 : index
      %35 = vector.load %arg4[%c0_24, %c64_25] : memref<1x384xf32, #tpu.memory_space<vmem>>, vector<1x64xf32>
      %cst_26 = arith.constant dense<0.000000e+00> : vector<8x64xf32>
      %36 = tpu.matmul %33, %34, %cst_26 {dimension_numbers = #tpu.dot_dimension_numbers<[1], [0], [0], [1], [0, 0, 1, 1], [], []>} : vector<8x32xf32>, vector<32x64xf32>, vector<8x64xf32> -> vector<8x64xf32>
      %37 = vector.broadcast %35 : vector<1x64xf32> to vector<8x64xf32>
      %38 = arith.addf %36, %37 : vector<8x64xf32>
      %cst_27 = arith.constant 0.000000e+00 : f32
      %39 = vector.broadcast %cst_27 : f32 to vector<8x64xf32>
      %40 = arith.maximumf %38, %39 : vector<8x64xf32>
      %c64_28 = arith.constant 64 : index
      %c0_29 = arith.constant 0 : index
      %41 = vector.load %arg5[%c64_28, %c0_29] : memref<192x128xf32, #tpu.memory_space<vmem>>, vector<64x128xf32>
      %cst_30 = arith.constant dense<0.000000e+00> : vector<8x128xf32>
      %42 = tpu.matmul %40, %41, %cst_30 {dimension_numbers = #tpu.dot_dimension_numbers<[1], [0], [0], [1], [0, 0, 1, 1], [], []>} : vector<8x64xf32>, vector<64x128xf32>, vector<8x128xf32> -> vector<8x128xf32>
      %43 = arith.addf %32, %42 : vector<8x128xf32>
      %c16 = arith.constant 16 : index
      %c0_31 = arith.constant 0 : index
      %44 = vector.load %arg7[%c16, %c0_31] : memref<24x32xf32, #tpu.memory_space<vmem>>, vector<8x32xf32>
      %c0_32 = arith.constant 0 : index
      %c128 = arith.constant 128 : index
      %45 = vector.load %arg3[%c0_32, %c128] : memref<32x192xf32, #tpu.memory_space<vmem>>, vector<32x64xf32>
      %c0_33 = arith.constant 0 : index
      %c128_34 = arith.constant 128 : index
      %46 = vector.load %arg4[%c0_33, %c128_34] : memref<1x384xf32, #tpu.memory_space<vmem>>, vector<1x64xf32>
      %cst_35 = arith.constant dense<0.000000e+00> : vector<8x64xf32>
      %47 = tpu.matmul %44, %45, %cst_35 {dimension_numbers = #tpu.dot_dimension_numbers<[1], [0], [0], [1], [0, 0, 1, 1], [], []>} : vector<8x32xf32>, vector<32x64xf32>, vector<8x64xf32> -> vector<8x64xf32>
      %48 = vector.broadcast %46 : vector<1x64xf32> to vector<8x64xf32>
      %49 = arith.addf %47, %48 : vector<8x64xf32>
      %cst_36 = arith.constant 0.000000e+00 : f32
      %50 = vector.broadcast %cst_36 : f32 to vector<8x64xf32>
      %51 = arith.maximumf %49, %50 : vector<8x64xf32>
      %c128_37 = arith.constant 128 : index
      %c0_38 = arith.constant 0 : index
      %52 = vector.load %arg5[%c128_37, %c0_38] : memref<192x128xf32, #tpu.memory_space<vmem>>, vector<64x128xf32>
      %cst_39 = arith.constant dense<0.000000e+00> : vector<8x128xf32>
      %53 = tpu.matmul %51, %52, %cst_39 {dimension_numbers = #tpu.dot_dimension_numbers<[1], [0], [0], [1], [0, 0, 1, 1], [], []>} : vector<8x64xf32>, vector<64x128xf32>, vector<8x128xf32> -> vector<8x128xf32>
      %54 = arith.addf %43, %53 : vector<8x128xf32>
      %c0_40 = arith.constant 0 : index
      %c0_41 = arith.constant 0 : index
      %55 = vector.load %arg6[%c0_40, %c0_41] : memref<8x128xf32, #tpu.memory_space<vmem>>, vector<8x128xf32>
      tpu.vector_store %arg6[%c0_40, %c0_41], %54 {strides = array<i32>} : memref<8x128xf32, #tpu.memory_space<vmem>>, vector<8x128xf32>,
    } else {
    }
    return
  }
  func.func @transform_0(%arg0: i32) -> (i32, i32) {
    %c0_i32 = arith.constant 0 : i32
    %c0_i32_0 = arith.constant 0 : i32
    return %arg0, %c0_i32 : i32, i32
  }
  func.func @transform_1(%arg0: i32) -> (i32, i32) {
    %c0_i32 = arith.constant 0 : i32
    %c0_i32_0 = arith.constant 0 : i32
    return %c0_i32, %arg0 : i32, i32
  }
  func.func @transform_2(%arg0: i32) -> (i32, i32) {
    %c0_i32 = arith.constant 0 : i32
    %c0_i32_0 = arith.constant 0 : i32
    %c0_i32_1 = arith.constant 0 : i32
    return %c0_i32, %c0_i32_0 : i32, i32
  }
  func.func @transform_3(%arg0: i32) -> (i32, i32) {
    %c0_i32 = arith.constant 0 : i32
    %c0_i32_0 = arith.constant 0 : i32
    %c0_i32_1 = arith.constant 0 : i32
    return %c0_i32, %c0_i32_0 : i32, i32
  }
  func.func @transform_4(%arg0: i32) -> (i32, i32) {
    %c0_i32 = arith.constant 0 : i32
    %c0_i32_0 = arith.constant 0 : i32
    %c0_i32_1 = arith.constant 0 : i32
    return %c0_i32, %c0_i32_0 : i32, i32
  }
  func.func @transform_5(%arg0: i32) -> (i32, i32) {
    %c0_i32 = arith.constant 0 : i32
    %c0_i32_0 = arith.constant 0 : i32
    %c0_i32_1 = arith.constant 0 : i32
    return %c0_i32, %c0_i32_0 : i32, i32
  }
}

</mosaic_0001>

<bundles_post_ra>
// kernel: tpu_custom_call.1
= control target key start
LH: loop header
LB: loop body
LE: loop exit
PB: predicated region body
PF: predicated region fallthrough
CT: control target
= control target key end

     0   :  { %10 = vsyncpa [#allocation4], 0  ;;  %s1621_s0 = inlined_call_operand.vmem [shape: bf16[384,32], index: 0, kind: input, shape index: {}]   ;;  %s1622_s1 = inlined_call_operand.vmem [shape: s32[1,384], index: 1, kind: input, shape index: {}]   ;;  %s1623_s2 = inlined_call_operand.hbm [shape: f32[32,192], index: 2, kind: input, shape index: {}]   ;;  %s1624_s3 = inlined_call_operand.vmem [shape: f32[1,384], index: 3, kind: input, shape index: {}]   ;;  %s1625_s4 = inlined_call_operand.vmem [shape: f32[192,128], index: 4, kind: input, shape index: {}]   ;;  %s1626_s5 = inlined_call_operand.hbm [shape: f32[8,128], index: 5, kind: output, shape index: {}]  }
   0x1   :  { %11 = vsyncpa [#allocation5], 0  ;;  %s1407_s18 = smov 0  }
   0x2 LB: > { %s1413_s19 = sadd.s32 4294967295, %s1365_s18   ;;  %p987_p0 = scmp.ge.s32.totalorder %s1365_s18, 1  ;;  %s1365_s18 = sphi %s1407_s18, %s17_s18  }
   0x3   : > { %p158_p1 = scmp.lt.s32.totalorder %s1365_s18, 4  ;;  %s1367_s20 = smov [#allocation3]  }
   0x4   : > { %s170_s21 = sshll.u32 %s1367_s20, 4  ;;  %p1627_p4 = scmp.eq.s32.totalorder %s1413_s19, 0  ;;  %s171_s21 = int_to_ptr.vmem [resolvable:$true] %s170_s21 }
   0x5   : > { %p1418_p3 = pnand %p987_p0, %p158_p1  ;;  %s1297_s26 = scalar_lea.hbm %s1623_s2, 1024 }
   0x6   : > { %p1298_p7 = scmp.ne.s32.totalorder %s1623_s2, %s1297_s26  ;;  %p1304_p11 = scmp.lt.u32.totalorder %s1297_s26, %s1623_s2 }
   0x7   : > { %s1629_s22 = scalar_select %p1418_p3, 1, 0 }
   0x8   : > { %p1253_p5 = pneg %p1418_p3 }
   0xa   : > { %p1427_p6 = pnand %p1627_p4, %p1253_p5 }
   0xc   : > { %p1299_p8 = pneg %p1427_p6 }
   0xe   : > { %p1300_p9 = pnand %p1299_p8, %p1298_p7 }
  0x10   : > { %p1301_p10 = pneg %p1300_p9 }
  0x12   : > { %p1306_p12 = pnand %p1304_p11, %p1301_p10 }
  0x14   : > { %1309 = shalt.err (!%p1306_p12)
}
  0x15   : > { %s1310_s6 = scalar_lea.vmem %s171_s21, 1024  ;;  %p1318_p5 = scmp.lt.s32.totalorder %s171_s21, %s171_s21 }
  0x16   : > { %p1311_p13 = scmp.ne.s32.totalorder %s171_s21, %s1310_s6  ;;  %p1319_p2 = scmp.lt.s32.totalorder %s1310_s6, %s1310_s6 }
  0x18   : > { %p1313_p0 = pnand %p1311_p13, %p1299_p8  ;;  %p1320_p4 = por %p1319_p2, %p1318_p5 }
  0x1a   : > { %p1314_p1 = pneg %p1313_p0 }
  0x1c   : > { %p1321_p3 = pnand %p1320_p4, %p1314_p1 }
  0x1e   : > { %1324 = shalt.err (!%p1321_p3)
}
  0x1f   : > { %s1368_s7 = smov 256   ;;  %s1369_s8 = smov 16  }
  0x20   : > { %1256 = dma.hbm_to_vmem [thread:$0]  (!%p1427_p6), %s1623_s2, 1024, %s171_s21, [#allocation4], %s1368_s7, %s1368_s7, %s1369_s8  }
  0x21   : > { %p1631_p7 = scmp.ne.s32.totalorder %s1629_s22, 0 }
  0x22   : > { %p1632_p9 = scmp.eq.s32.totalorder (!%p1631_p7), %s1413_s19, 0 }
  0x23   : > { %207 = sbr.rel (%p1631_p7) target bundleno = 1005 (0x3ed), region = 40 }
  0x2a   : > { %1356 = dma.done.wait (%p1632_p9), [#allocation4], 1024   ;;  %p1633_p8 = pmov %p1632_p9 }
  0x2b   : > { %s992_s11 = sshll.u32 %s1413_s19, 4  ;;  %p239_p2 = scmp.lt.s32.totalorder %s1413_s19, 2 }
  0x2c   : > { %1358 = vsyncadd (%p1633_p8), [#allocation4], 4294966272  ;;  %p234_p3 = scmp.lt.s32.totalorder %s992_s11, 47  ;;  %p1634_p4 = scmp.ne.s32.totalorder %s1413_s19, 0 }
  0x2d   : > { %s240_s12 = scalar_select %p239_p2, %s1413_s19, 2 }
  0x2e   : > { %s1636_s11 = smov (!%p234_p3, %s992_s11), 47  ;;  %246 = sbr.rel (%p1634_p4) target bundleno = 53 (0x35), region = 48 }
  0x2f   : > { %s241_s15 = scalar_lea.vmem %s1622_s1, %s240_s12  ;;  %s993_s16 = sshll.u32 %s1636_s11, 2  ;;  %vm247_vm0 = vcmask (!%p1634_p4), 261120   ;;  %v1370_v0 = vmov (!%p1634_p4), 0.0  }
  0x30   : > { %s1462_s21 = scalar_lea.vmem %s1621_s0, %s993_s16  ;;  %248 = vst.msk [vmem:[#allocation2] sm:$0xff] (!%p1634_p4), %vm247_vm0, %v1370_v0  ;;  %249 = vst.msk [vmem:[#allocation2 + $0x8] sm:$0xff] (!%p1634_p4), %vm247_vm0, %v1370_v0 }
  0x31   : > { %250 = vst.msk [vmem:[#allocation2 + $0x10] sm:$0xff] (!%p1634_p4), %vm247_vm0, %v1370_v0 }
  0x35 PF: > { %v1279_v1 = vld [vmem:[%s1462_s21] sm:$0xff]   ;;  %v251_v2 = vlaneseq  ;;  %v1280_v3 = vld [vmem:[%s1462_s21 + $0x8] sm:$0xff]   ;;  %v1281_v5 = vld [vmem:[%s1462_s21 + $0x10] sm:$0xff]   ;;  %v1371_v9 = vmov 1.0|1.0   ;;  %vm389_vm6 = vcmask 261120  }
  0x36   : > { %1077 = vmatprep.subr.bf16.mxu0 %v1279_v1  ;;  %v1282_v7 = vld [vmem:[%s1462_s21 + $0x18] sm:$0xff]   ;;  %v995_v8 = vld [vmem:[%s241_s15] ss:$0 sm:$0xff]  ;;  %v1284_v11 = vld [vmem:[%s1462_s21 + $0x28] sm:$0xff]   ;;  %p1011_p6 = scmp.ne.s32.totalorder %s1413_s19, 2 }
  0x37   : > { %v252_v4 = vshrl.u32 %v251_v2, 7  ;;  %1078 = vmatpush3.bf16.msra.mxu0 %v1279_v1  ;;  %v1283_v10 = vld [vmem:[%s1462_s21 + $0x20] sm:$0xff]   ;;  %v1285_v12 = vld [vmem:[%s1462_s21 + $0x30] sm:$0xff]   ;;  %v1286_v13 = vld [vmem:[%s1462_s21 + $0x38] sm:$0xff]   ;;  %v1372_v28 = vmov (!%p1011_p6), 0.0|0.0   ;;  %vm1373_vm7 = vmmov (!%p1011_p6), 0  }
  0x38   : > { %1079 = vmatprep.subr.bf16.mxu0 %v1280_v3  ;;  %v273_v15 = vld [vmem:[#allocation2 + $0x10] sm:$0xff]  ;;  %v271_v16 = vld [vmem:[#allocation2] sm:$0xff]  ;;  %v272_v20 = vld [vmem:[#allocation2 + $0x8] sm:$0xff]  ;;  %v1374_v31 = vmov (!%p1011_p6), 0.0   ;;  %1211 = vmatprep.subr.bf16.mxu1 (!%p1011_p6), %v1372_v28  ;;  %s1375_s22 = smov (!%p1011_p6), 64   ;;  %vm499_vm8 = vcmask (!%p1011_p6), 523264  }
  0x39   : > { %v253_v6 = vadd.s32 8, %v252_v4  ;;  %vm260_vm1 = vcmp.eq.s32.totalorder %v252_v4, %v995_v8  ;;  %v254_v14 = vadd.s32 16, %v252_v4  ;;  %v406_v25 = vld [vmem:[#allocation3] sm:$0xff] (!%p1011_p6)  ;;  %v407_v26 = vld [vmem:[#allocation3 + $0x10] sm:$0xff] (!%p1011_p6)  ;;  %1154 = vmatprep.mubr.msk.f32.mxu1 (!%p1011_p6), %vm1373_vm7, %v1374_v31  ;;  %v1013_v35 = vld [vmem:[%s1624_s3] ss:$0 sm:$0xff] (!%p1011_p6) }
  0x3a   : > { %v408_v27 = vld [vmem:[#allocation3 + $0x20] sm:$0xff] (!%p1011_p6)  ;;  %v1188_v29 = vpack.c.bf16 (!%p1011_p6), %v407_v26, %v406_v25  ;;  %v409_v30 = vld [vmem:[#allocation3 + $0x30] sm:$0xff] (!%p1011_p6)  ;;  %v1287_v32 = vpack.i.bf16 (!%p1011_p6), %v407_v26, %v406_v25  ;;  %v491_v36 = vld [vmem:[%s1625_s4] sm:$0xff] (!%p1011_p6)  ;;  %591 = vrot.lane.b32.xlu1 (!%p1011_p6), %v1013_v35, %s1375_s22 }
  0x3b   : > { %1080 = vmatpush3.bf16.msra.mxu0 %v1280_v3  ;;  %vm261_vm2 = vcmp.eq.s32.totalorder %v253_v6, %v995_v8  ;;  %vm262_vm4 = vcmp.eq.s32.totalorder %v254_v14, %v995_v8  ;;  %v1191_v33 = vpack.c.bf16 (!%p1011_p6), %v409_v30, %v408_v27  ;;  %v1292_v34 = vpack.i.bf16 (!%p1011_p6), %v409_v30, %v408_v27  ;;  %v492_v37 = vld [vmem:[%s1625_s4 + $0x8] sm:$0xff] (!%p1011_p6)  ;;  %v493_v40 = vld [vmem:[%s1625_s4 + $0x10] sm:$0xff] (!%p1011_p6)  ;;  %v494_v41 = vld [vmem:[%s1625_s4 + $0x18] sm:$0xff] (!%p1011_p6) }
  0x3c   : > { %1081 = vmatprep.subr.bf16.mxu0 %v1281_v5  ;;  %vm1007_vm3 = vmpackc.low %vm261_vm2, %vm260_vm1  ;;  %1288 = vrot.lane.b32.xlu0 (!%p1011_p6), %v1287_v32, %s1375_s22  ;;  %v1194_v39 = vpack.c.bf16 (!%p1011_p6), %v492_v37, %v491_v36  ;;  %v1197_v42 = vpack.c.bf16 (!%p1011_p6), %v494_v41, %v493_v40  ;;  %v495_v43 = vld [vmem:[%s1625_s4 + $0x20] sm:$0xff] (!%p1011_p6)  ;;  %v496_v44 = vld [vmem:[%s1625_s4 + $0x28] sm:$0xff] (!%p1011_p6) }
  0x3d   : > { %1093 = vmatprep.mubr.msk.bf16.mxu0 %vm1007_vm3, %v1371_v9  ;;  %vm1009_vm5 = vmpackc.low %vm262_vm4, %vm262_vm4  ;;  %v1200_v45 = vpack.c.bf16 (!%p1011_p6), %v496_v44, %v495_v43  ;;  %v497_v46 = vld [vmem:[%s1625_s4 + $0x30] sm:$0xff] (!%p1011_p6)  ;;  %v498_v47 = vld [vmem:[%s1625_s4 + $0x38] sm:$0xff] (!%p1011_p6) }
  0x3e   : > { %v1203_v48 = vpack.c.bf16 (!%p1011_p6), %v498_v47, %v497_v46  ;;  %v668_v49 = vld [vmem:[%s1625_s4 + $0x40] sm:$0xff] (!%p1011_p6)  ;;  %v669_v50 = vld [vmem:[%s1625_s4 + $0x48] sm:$0xff] (!%p1011_p6)  ;;  %v752_v1 = vld [vmem:[#allocation3 + $0x18] sm:$0xff] (!%p1011_p6) }
  0x3f   : > { %1082 = vmatpush3.bf16.msra.mxu0 %v1281_v5  ;;  %v1212_v51 = vpack.c.bf16 (!%p1011_p6), %v669_v50, %v668_v49  ;;  %v751_v0 = vld [vmem:[#allocation3 + $0x8] sm:$0xff] (!%p1011_p6)  ;;  %v754_v5 = vld [vmem:[#allocation3 + $0x38] sm:$0xff] (!%p1011_p6) }
  0x40   : > { %1083 = vmatprep.subr.bf16.mxu0 %v1282_v7  ;;  %1293 = vrot.lane.b32.xlu0 (!%p1011_p6), %v1292_v34, %s1375_s22  ;;  %v1224_v3 = vpack.c.bf16 (!%p1011_p6), %v752_v1, %v751_v0  ;;  %v753_v4 = vld [vmem:[#allocation3 + $0x28] sm:$0xff] (!%p1011_p6)  ;;  %v670_v8 = vld [vmem:[%s1625_s4 + $0x50] sm:$0xff] (!%p1011_p6) }
  0x41   : > { %1213 = vmatpush3.bf16.msra.mxu1 (!%p1011_p6), %v1212_v51  ;;  %v1227_v6 = vpack.c.bf16 (!%p1011_p6), %v754_v5, %v753_v4  ;;  %v674_v14 = vld [vmem:[%s1625_s4 + $0x70] sm:$0xff] (!%p1011_p6)  ;;  %v840_v32 = vld [vmem:[%s1625_s4 + $0xa0] sm:$0xff] (!%p1011_p6) }
  0x42   : > { %1214 = vmatprep.subr.bf16.mxu1 (!%p1011_p6), %v1372_v28  ;;  %v838_v27 = vld [vmem:[%s1625_s4 + $0x90] sm:$0xff] (!%p1011_p6)  ;;  %v1018_v37 = vld [vmem:[%s1624_s3 + $0x1] ss:$0 sm:$0xff] (!%p1011_p6) }
  0x43   : > { %1084 = vmatpush3.bf16.msra.mxu0 %v1282_v7 }
  0x44   : > { %1085 = vmatprep.subr.bf16.mxu0 %v1283_v10 }
  0x47   : > { %1086 = vmatpush3.bf16.msra.mxu0 %v1283_v10 }
  0x48   : > { %1087 = vmatprep.subr.bf16.mxu0 %v1284_v11 }
  0x4b   : > { %1088 = vmatpush3.bf16.msra.mxu0 %v1284_v11  ;;  %v672_v11 = vld [vmem:[%s1625_s4 + $0x60] sm:$0xff] (!%p1011_p6) }
  0x4c   : > { %1089 = vmatprep.subr.bf16.mxu0 %v1285_v12 }
  0x4f   : > { %1090 = vmatpush3.bf16.msra.mxu0 %v1285_v12  ;;  %v673_v12 = vld [vmem:[%s1625_s4 + $0x68] sm:$0xff] (!%p1011_p6) }
  0x50   : > { %1091 = vmatprep.subr.bf16.mxu0 %v1286_v13 }
  0x53   : > { %1092 = vmatpush3.bf16.msra.mxu0 %v1286_v13  ;;  %v1218_v13 = vpack.c.bf16 (!%p1011_p6), %v673_v12, %v672_v11 }
  0x54   : > { %1187 = vmatprep.subr.bf16.mxu0 (!%p1011_p6), %v1372_v28 }
  0x56   : > { %1094 = vmatmul.mubr.msk.bf16.vlgmr.msra.gmra.mrb[0].mxu0 %vm1009_vm5, %v1371_v9  ;;  %v671_v9 = vld [vmem:[%s1625_s4 + $0x58] sm:$0xff] (!%p1011_p6) }
  0x57   : > { %1105 = vmatprep.mubr.msk.f32.mxu0 (!%p1011_p6), %vm1373_vm7, %v1374_v31  ;;  %1189 = vmatpush3.bf16.msra.mxu0 (!%p1011_p6), %v1188_v29  ;;  %v1215_v10 = vpack.c.bf16 (!%p1011_p6), %v671_v9, %v670_v8  ;;  %v839_v29 = vld [vmem:[%s1625_s4 + $0x98] sm:$0xff] (!%p1011_p6) }
  0x58   : > { %1190 = vmatprep.subr.bf16.mxu0 (!%p1011_p6), %v1372_v28  ;;  %v1233_v30 = vpack.c.bf16 (!%p1011_p6), %v839_v29, %v838_v27 }
  0x59   : > { %1216 = vmatpush3.bf16.msra.mxu1 (!%p1011_p6), %v1215_v10 }
  0x5a   : > { %1217 = vmatprep.subr.bf16.mxu1 (!%p1011_p6), %v1372_v28 }
  0x5b   : > { %1192 = vmatpush3.bf16.msra.mxu0 (!%p1011_p6), %v1191_v33  ;;  %v841_v33 = vld [vmem:[%s1625_s4 + $0xa8] sm:$0xff] (!%p1011_p6) }
  0x5c   : > { %1193 = vmatprep.subr.bf16.mxu0 (!%p1011_p6), %v1372_v28  ;;  %v1236_v36 = vpack.c.bf16 (!%p1011_p6), %v841_v33, %v840_v32 }
  0x5d   : > { %1219 = vmatpush3.bf16.msra.mxu1 (!%p1011_p6), %v1218_v13 }
  0x5e   : > { %1220 = vmatprep.subr.bf16.mxu1 (!%p1011_p6), %v1372_v28 }
  0xae   : > { %v1289_v52 = vpop.permute.xlu0 (!%p1011_p6), %1288 }
  0xaf   : > { %v1291_v53 = vunpack.i.h.bf16 (!%p1011_p6), %v1289_v52  ;;  %v1290_v54 = vunpack.i.l.bf16 (!%p1011_p6), %v1289_v52 }
  0xb1   : > { %v1206_v59 = vpack.c.bf16 (!%p1011_p6), %v1291_v53, %v1290_v54 }
  0xb2   : > { %v1294_v55 = vpop.permute.xlu0 (!%p1011_p6), %1293 }
  0xb3   : > { %v1296_v60 = vunpack.i.h.bf16 (!%p1011_p6), %v1294_v55  ;;  %v1295_v61 = vunpack.i.l.bf16 (!%p1011_p6), %v1294_v55 }
  0xb5   : > { %v1209_v63 = vpack.c.bf16 (!%p1011_p6), %v1296_v60, %v1295_v61 }
 0x129   : > { %v1095_v17 = vpop.f32.mrb[0].mxu0  ;;  %396 = sbr.rel (%p1011_p6) target bundleno = 980 (0x3d4), region = 52 }
 0x12a   : > { %v388_v18 = vadd.f32 %v1095_v17, %v273_v15  ;;  %v372_v19 = vpop.f32.mrb[1].mxu0  ;;  %v675_v15 = vld [vmem:[%s1625_s4 + $0x78] sm:$0xff] (!%p1011_p6) }
 0x12b   : > { %v386_v21 = vadd.f32 %v372_v19, %v271_v16  ;;  %v1096_v22 = vpop.f32.mrb[2].mxu0  ;;  %v1221_v16 = vpack.c.bf16 (!%p1011_p6), %v675_v15, %v674_v14  ;;  %v592_v19 = vpop.permute.xlu1 (!%p1011_p6), %591 }
 0x12c   : > { %392 = vst.msk [vmem:[#allocation2 + $0x10] sm:$0xff] %vm389_vm6, %v388_v18  ;;  %v375_v23 = vpop.f32.mrb[3].mxu0 }
 0x12d   : > { %390 = vst.msk [vmem:[#allocation2] sm:$0xff] %vm389_vm6, %v386_v21  ;;  %v387_v24 = vadd.f32 %v375_v23, %v272_v20  ;;  %1222 = vmatpush3.bf16.msra.mxu1 (!%p1011_p6), %v1221_v16  ;;  %v836_v20 = vld [vmem:[%s1625_s4 + $0x80] sm:$0xff] (!%p1011_p6)  ;;  %v837_v21 = vld [vmem:[%s1625_s4 + $0x88] sm:$0xff] (!%p1011_p6) }
 0x12e   : > { %1229 = vmatprep.subr.bf16.mxu1 (!%p1011_p6), %v1372_v28  ;;  %v1230_v25 = vpack.c.bf16 (!%p1011_p6), %v837_v21, %v836_v20 }
 0x12f   : > { %391 = vst.msk [vmem:[#allocation2 + $0x8] sm:$0xff] %vm389_vm6, %v387_v24 }
 0x133   : > { %v750_v7 = vld [vmem:[#allocation2 + $0x10] sm:$0xff] }
 0x134   : > { %v405_v38 = vld [vmem:[#allocation2] sm:$0xff] }
 0x135   : > { %1106 = vmatmul.mubr.msk.f32.vlgmr.msra.gmra.mrb[0].mxu0 %vm389_vm6, %v405_v38  ;;  %v843_v38 = vld [vmem:[%s1625_s4 + $0xb8] sm:$0xff] }
 0x136   : > { %1195 = vmatpush3.bf16.msra.mxu0 %v1194_v39  ;;  %1124 = vmatprep.mubr.msk.f32.mxu0 %vm1373_vm7, %v1374_v31  ;;  %v574_v2 = vld [vmem:[#allocation2 + $0x8] sm:$0xff] }
 0x137   : > { %1196 = vmatprep.subr.bf16.mxu0 %v1372_v28 }
 0x13a   : > { %1198 = vmatpush3.bf16.msra.mxu0 %v1197_v42  ;;  %v1012_v42 = vld [vmem:[%s1624_s3 + $0x2] ss:$0 sm:$0xff] }
 0x13b   : > { %1199 = vmatprep.subr.bf16.mxu0 %v1372_v28 }
 0x13e   : > { %1201 = vmatpush3.bf16.msra.mxu0 %v1200_v45 }
 0x13f   : > { %1202 = vmatprep.subr.bf16.mxu0 %v1372_v28 }
 0x142   : > { %1204 = vmatpush3.bf16.msra.mxu0 %v1203_v48 }
 0x143   : > { %1205 = vmatprep.subr.bf16.mxu0 %v1372_v28 }
 0x208   : > { %v486_v56 = vpop.f32.mrb[0].mxu0 }
 0x209   : > { %v487_v57 = vadd.f32 %v1013_v35, %v486_v56  ;;  %v1107_v58 = vpop.f32.mrb[1].mxu0 }
 0x20b   : > { %v490_v62 = vmax.f32 %v487_v57, 0.0 }
 0x20d   : > { %1125 = vmatmul.mubr.msk.f32.vlgmr.msra.gmra.mrb[2].mxu0 %vm499_vm8, %v490_v62 }
 0x20e   : > { %1207 = vmatpush3.bf16.msra.mxu0 %v1206_v59  ;;  %1135 = vmatprep.mubr.msk.f32.mxu0 %vm1373_vm7, %v1374_v31 }
 0x20f   : > { %1208 = vmatprep.subr.bf16.mxu0 %v1372_v28 }
 0x212   : > { %1210 = vmatpush3.bf16.msra.mxu0 %v1209_v63 }
 0x213   : > { %1223 = vmatprep.subr.bf16.mxu0 %v1372_v28 }
 0x215   : > { %1136 = vmatmul.mubr.msk.f32.vlgmr.msra.gmra.mrb[4].mxu0 %vm389_vm6, %v574_v2 }
 0x216   : > { %1225 = vmatpush3.bf16.msra.mxu0 %v1224_v3  ;;  %1165 = vmatprep.mubr.msk.f32.mxu0 %vm1373_vm7, %v1374_v31 }
 0x217   : > { %1226 = vmatprep.subr.bf16.mxu0 %v1372_v28 }
 0x21a   : > { %1228 = vmatpush3.bf16.msra.mxu0 %v1227_v6 }
 0x21d   : > { %1166 = vmatmul.mubr.msk.f32.vlgmr.msra.gmra.mrb[6].mxu0 %vm389_vm6, %v750_v7 }
 0x2e0   : > { %v569_v17 = vpop.f32.mrb[2].mxu0 }
 0x2e1   : > { %v1126_v18 = vpop.f32.mrb[3].mxu0  ;;  %v573_v43 = vadd.f32 %v1012_v42, %v569_v17 }
 0x2e8   : > { %v663_v22 = vpop.f32.mrb[4].mxu0 }
 0x2e9   : > { %v664_v23 = vadd.f32 %v663_v22, %v592_v19  ;;  %v1137_v24 = vpop.f32.mrb[5].mxu0 }
 0x2eb   : > { %v667_v26 = vmax.f32 %v664_v23, 0.0 }
 0x2ed   : > { %1155 = vmatmul.mubr.msk.f32.vlgmr.msra.gmra.mrb[0].mxu1 %vm499_vm8, %v667_v26 }
 0x2ee   : > { %1231 = vmatpush3.bf16.msra.mxu1 %v1230_v25  ;;  %1184 = vmatprep.mubr.msk.f32.mxu1 %vm1373_vm7, %v1374_v31  ;;  %v842_v31 = vld [vmem:[%s1625_s4 + $0xb0] sm:$0xff] }
 0x2ef   : > { %1232 = vmatprep.subr.bf16.mxu1 %v1372_v28  ;;  %v1239_v40 = vpack.c.bf16 %v843_v38, %v842_v31 }
 0x2f0   : > { %v831_v34 = vpop.f32.mrb[6].mxu0 }
 0x2f1   : > { %v1167_v35 = vpop.f32.mrb[7].mxu0  ;;  %v832_v39 = vadd.f32 %v1018_v37, %v831_v34 }
 0x2f2   : > { %1234 = vmatpush3.bf16.msra.mxu1 %v1233_v30 }
 0x2f3   : > { %1235 = vmatprep.subr.bf16.mxu1 %v1372_v28  ;;  %v835_v41 = vmax.f32 %v832_v39, 0.0 }
 0x2f6   : > { %1237 = vmatpush3.bf16.msra.mxu1 %v1236_v36 }
 0x2f7   : > { %1238 = vmatprep.subr.bf16.mxu1 %v1372_v28 }
 0x2fa   : > { %1240 = vmatpush3.bf16.msra.mxu1 %v1239_v40 }
 0x2fd   : > { %1185 = vmatmul.mubr.msk.f32.vlgmr.msra.gmra.mrb[0].mxu1 %vm499_vm8, %v835_v41 }
 0x3d0   : > { %v913_v44 = vpop.f32.mrb[0].mxu1 }
 0x3d1   : > { %v1242_v45 = vadd.f32 %v913_v44, %v573_v43  ;;  %v1186_v46 = vpop.f32.mrb[1].mxu1 }
 0x3d3   : > { %918 = vst [vmem:[#allocation6] sm:$0xff] %v1242_v45 }
 0x3d4 PF: > { %p1259_p10 = scmp.eq.s32.totalorder %s1413_s19, 2  ;;  %s1376_s6 = smov [#allocation6]  }
 0x3d5   : > { %s926_s7 = sshll.u32 %s1376_s6, 4  ;;  %s927_s7 = int_to_ptr.vmem [resolvable:$true] %s926_s7 }
 0x3d6   : > { %s1325_s8 = scalar_lea.vmem %s927_s7, 128  ;;  %p1332_p0 = scmp.lt.s32.totalorder %s927_s7, %s927_s7 }
 0x3d7   : > { %p1326_p11 = scmp.ne.s32.totalorder %s927_s7, %s1325_s8  ;;  %p1333_p1 = scmp.lt.s32.totalorder %s1325_s8, %s1325_s8 }
 0x3d9   : > { %p1327_p12 = pnand %p1326_p11, %p1259_p10  ;;  %p1334_p5 = por %p1333_p1, %p1332_p0 }
 0x3db   : > { %p1328_p13 = pneg %p1327_p12 }
 0x3dd   : > { %p1335_p7 = pnand %p1334_p5, %p1328_p13 }
 0x3df   : > { %1338 = shalt.err (!%p1335_p7)
}
 0x3e0   : > { %s1339_s11 = scalar_lea.hbm %s1626_s5, 128 }
 0x3e1   : > { %p1340_p9 = scmp.ne.s32.totalorder %s1626_s5, %s1339_s11  ;;  %p1345_p3 = scmp.lt.u32.totalorder %s1339_s11, %s1626_s5 }
 0x3e3   : > { %p1341_p8 = pnand %p1340_p9, %p1259_p10 }
 0x3e5   : > { %p1342_p2 = pneg %p1341_p8 }
 0x3e7   : > { %p1347_p4 = pnand %p1345_p3, %p1342_p2 }
 0x3e9   : > { %1350 = shalt.err (!%p1347_p4)
}
 0x3ea   : > { %1250 = dma.vmem_to_hbm [thread:$0]  (%p1259_p10), %s927_s7, 128, %s1626_s5, [#allocation5]  }
 0x3eb   : > { %1360 = dma.done.wait (%p1259_p10), [#allocation5], 128  }
 0x3ec   : > { %1362 = vsyncadd (%p1259_p10), [#allocation5], 4294967168 }
 0x3ed PF: > { %s17_s18 = sadd.s32 1, %s1365_s18  }
 0x3ee   : > { %p14_p6 = scmp.ge.s32.totalorder %s17_s18, 5  }
 0x3f0   :  { %16 = sbr.rel (!%p14_p6) target bundleno = 2 (0x2), region = 83 }
 0x3f7   :  { %939 = vsyncpa [#allocation4], 1 }
 0x3f8   :  { %941 = vsyncpa [#allocation4 + $0x1], 1 }
 0x3f9   :  { %942 = vsyncpa [#allocation5], 1 }
 0x3fa   :  { %944 = vsyncpa [#allocation5 + $0x1], 1 }

</bundles_post_ra>
